<compile_context>
chip_gen: v7x
topology: tpu7x:2x2x1
jax: 0.10.0
libtpu: 0.0.40
codegen_flags: <defaults>
</compile_context>

<pallas_src>
import jax
import jax.numpy as jnp
from jax.experimental import pallas as pl
from jax.experimental.pallas import tpu as pltpu


def _round_up(n, m):
    return ((n + m - 1) // m) * m


# ----------------------------------------------------------------------------
# Phase 1 / 3 kernel: tiled GEMM + bias (used for the batched input and output
# projections that were hoisted out of the recurrence).
# ----------------------------------------------------------------------------
def _gemm_bias_kernel(a_ref, b_ref, bias_ref, o_ref, acc_ref):
    @pl.when(pl.program_id(2) == 0)
    def _():
        acc_ref[...] = jnp.zeros_like(acc_ref)

    acc_ref[...] += jnp.dot(a_ref[...], b_ref[...],
                            preferred_element_type=jnp.float32)

    @pl.when(pl.program_id(2) == pl.num_programs(2) - 1)
    def _():
        o_ref[...] = (acc_ref[...] + bias_ref[...]).astype(o_ref.dtype)


def _pallas_gemm_bias(a, w, bias, out_dtype=jnp.float32, tm=128):
    """out = a @ w + bias.  w: [K, N] (K, N multiples of 128), bias: [1, N] f32."""
    M, K = a.shape
    K2, N = w.shape
    assert K == K2 and K % 128 == 0 and N % 128 == 0
    tn = 256 if N % 256 == 0 else 128
    tk = 256 if K % 256 == 0 else 128

    Mp = _round_up(max(M, tm), tm)
    a_p = a.astype(w.dtype)
    if Mp != M:
        a_p = jnp.zeros((Mp, K), w.dtype).at[:M].set(a_p)

    out = pl.pallas_call(
        _gemm_bias_kernel,
        out_shape=jax.ShapeDtypeStruct((Mp, N), out_dtype),
        grid_spec=pltpu.PrefetchScalarGridSpec(
            num_scalar_prefetch=0,
            grid=(Mp // tm, N // tn, K // tk),
            in_specs=[
                pl.BlockSpec((tm, tk), lambda i, j, k: (i, k)),
                pl.BlockSpec((tk, tn), lambda i, j, k: (k, j)),
                pl.BlockSpec((1, tn), lambda i, j, k: (0, j)),
            ],
            out_specs=pl.BlockSpec((tm, tn), lambda i, j, k: (i, j)),
            scratch_shapes=[pltpu.VMEM((tm, tn), jnp.float32)],
        ),
        compiler_params=pltpu.CompilerParams(
            dimension_semantics=("parallel", "parallel", "arbitrary")),
    )(a_p, w, bias)
    return out[:M]


# ----------------------------------------------------------------------------
# Phase 2 kernel: the recurrence.  One grid step == one chunk of TT time steps.
# Only the truly sequential work lives here:
#   pre_t  = xproj_t + h @ W_ih_h        (xproj precomputed in Phase 1)
#   h1_t   = tanh(pre_t)
#   h_t    = h1_t @ W_hh + b_hh          (stored to hseq; projected in Phase 3)
# ----------------------------------------------------------------------------
def _rnn_recurrent_kernel(xp_ref, h0_ref, w_ih_h_ref, w_hh_ref, b_hh_ref,
                          hseq_ref, h_scratch):
    @pl.when(pl.program_id(0) == 0)
    def _():
        h_scratch[...] = h0_ref[...]

    w_dtype = w_ih_h_ref.dtype
    tt = xp_ref.shape[0]

    def step(i, h):
        pre = xp_ref[i] + jnp.dot(h.astype(w_dtype), w_ih_h_ref[...],
                                  preferred_element_type=jnp.float32)
        h1 = jnp.tanh(pre)                                   # f32, EUP
        new_h = jnp.dot(h1.astype(w_dtype), w_hh_ref[...],
                        preferred_element_type=jnp.float32) + b_hh_ref[...]
        hseq_ref[i] = new_h.astype(hseq_ref.dtype)
        return new_h

    # Hidden state carried as an f32 value through an unrolled loop; written
    # back to the VMEM scratch once per chunk.
    h_scratch[...] = jax.lax.fori_loop(0, tt, step, h_scratch[...],
                                       unroll=True)


def _run_recurrence(xproj, h0_pad, params, Tp, TT, Bp, Hp):
    w_ih_h, w_hh, b_hh = params["w_ih_h"], params["w_hh"], params["b_hh"]

    def build(single_buffer):
        # Constant-index operands are never re-fetched; single-buffering them
        # halves their resident VMEM footprint (matters once Hp grows / v7x).
        res = {"pipeline_mode": pl.Buffered(1)} if single_buffer else {}
        return pl.pallas_call(
            _rnn_recurrent_kernel,
            out_shape=jax.ShapeDtypeStruct((Tp, Bp, Hp), jnp.float32),
            grid_spec=pltpu.PrefetchScalarGridSpec(
                num_scalar_prefetch=0,
                grid=(Tp // TT,),
                in_specs=[
                    pl.BlockSpec((TT, Bp, Hp), lambda c: (c, 0, 0)),    # xproj chunk
                    pl.BlockSpec((Bp, Hp), lambda c: (0, 0), **res),    # h0
                    pl.BlockSpec((Hp, Hp), lambda c: (0, 0), **res),    # W_ih (h half)
                    pl.BlockSpec((Hp, Hp), lambda c: (0, 0), **res),    # W_hh
                    pl.BlockSpec((1, Hp), lambda c: (0, 0), **res),     # b_hh
                ],
                out_specs=pl.BlockSpec((TT, Bp, Hp), lambda c: (c, 0, 0)),
                scratch_shapes=[pltpu.VMEM((Bp, Hp), jnp.float32)],     # carried h
            ),
            compiler_params=pltpu.CompilerParams(
                # Time axis carries the recurrence -> sequential.
                dimension_semantics=("arbitrary",),
            ),
        )

    try:
        return build(True)(xproj, h0_pad, w_ih_h, w_hh, b_hh)
    except Exception:
        # Fallback if pipeline_mode=pl.Buffered(1) is unsupported in this build.
        return build(False)(xproj, h0_pad, w_ih_h, w_hh, b_hh)


# ----------------------------------------------------------------------------
# Wrappers
# ----------------------------------------------------------------------------
def custom_rnn_sequence(x_seq, h0, params, *, time_chunk=8):
    """Run the CustomRNN over a whole sequence.

    x_seq : [T, B, input_size]
    h0    : [B, hidden_size]
    Returns (outputs [T, B, output_size], final_hidden [B, hidden_size]).
    """
    T, B, I = x_seq.shape
    H = h0.shape[1]
    meta = params["meta"]
    assert I == meta["input_size"] and H == meta["hidden_size"]
    O = meta["output_size"]
    Ip, Hp, Op = meta["i_pad"], meta["h_pad"], meta["o_pad"]

    cdt = params["w_ih_x"].dtype
    sub = 16 if cdt == jnp.bfloat16 else 8        # bf16 sublane packing = 16 rows
    Bp = _round_up(max(B, sub), sub)

    TT = max(1, min(time_chunk, T))
    Tp = _round_up(T, TT)

    # Per-sequence (not per-step) input padding / casting.
    x_pad = jnp.zeros((Tp, Bp, Ip), cdt).at[:T, :B, :I].set(x_seq.astype(cdt))
    h0_pad = jnp.zeros((Bp, Hp), jnp.float32).at[:B, :H].set(
        h0.astype(jnp.float32))

    # Phase 1: batched input projection (no bias) — one big GEMM, no recurrence.
    zero_bias_h = jnp.zeros((1, Hp), jnp.float32)
    xproj = _pallas_gemm_bias(x_pad.reshape(Tp * Bp, Ip), params["w_ih_x"],
                              zero_bias_h, jnp.float32).reshape(Tp, Bp, Hp)

    # Phase 2: sequential recurrence, chunked over time.
    hseq = _run_recurrence(xproj, h0_pad, params, Tp, TT, Bp, Hp)

    # Phase 3: batched output projection — one big GEMM over all real steps.
    out = _pallas_gemm_bias(hseq[:T].reshape(T * Bp, Hp), params["w_ho"],
                            params["b_ho"], jnp.float32).reshape(T, Bp, Op)

    return out[:, :B, :O], hseq[T - 1, :B, :H]


def custom_rnn_step(x, hidden_state, params):
    """Single CustomRNN.forward(x, hidden_state) -> (output, new_hidden)."""
    out_seq, new_h = custom_rnn_sequence(x[None], hidden_state, params)
    return out_seq[0], new_h


# ----------------------------------------------------------------------------
# Parameters
# ----------------------------------------------------------------------------
def init_params(key, input_size, hidden_size, output_size):
    """Raw f32 params; weights stored [in, out] (transposed vs. nn.Linear)."""
    k1, k2, k3, k4, k5 = jax.random.split(key, 5)
    scale = 0.1
    return {
        "w_ih": scale * jax.random.normal(
            k1, (input_size + hidden_size, hidden_size), jnp.float32),
        "w_hh": scale * jax.random.normal(
            k2, (hidden_size, hidden_size), jnp.float32),
        "b_hh": scale * jax.random.normal(k3, (hidden_size,), jnp.float32),
        "w_ho": scale * jax.random.normal(
            k4, (hidden_size, output_size), jnp.float32),
        "b_ho": scale * jax.random.normal(k5, (output_size,), jnp.float32),
    }


def prepare_params(raw, input_size, hidden_size, output_size,
                   compute_dtype=jnp.float32, lane_multiple=128):
    """One-time param prep (hoisted out of the per-call path).

    * Zero-pad every feature dim to a multiple of `lane_multiple` (128 default;
      use 256 on v6e/v7x when real dims allow) — lane-dense MXU tiles and
      unmasked vector stores.  Zero padding keeps padded lanes/rows inert.
    * W_ih is split into its x-half and h-half so the kernel never needs an
      in-kernel concatenate.
    * Optional bf16 weight cast (biases / accumulation / tanh stay f32).
    """
    Ip = _round_up(input_size, lane_multiple)
    Hp = _round_up(hidden_size, lane_multiple)
    Op = _round_up(output_size, lane_multiple)

    w_ih_x = jnp.zeros((Ip, Hp), compute_dtype).at[
        :input_size, :hidden_size].set(
        raw["w_ih"][:input_size].astype(compute_dtype))
    w_ih_h = jnp.zeros((Hp, Hp), compute_dtype).at[
        :hidden_size, :hidden_size].set(
        raw["w_ih"][input_size:].astype(compute_dtype))
    w_hh = jnp.zeros((Hp, Hp), compute_dtype).at[
        :hidden_size, :hidden_size].set(raw["w_hh"].astype(compute_dtype))
    w_ho = jnp.zeros((Hp, Op), compute_dtype).at[
        :hidden_size, :output_size].set(raw["w_ho"].astype(compute_dtype))

    b_hh = jnp.zeros((1, Hp), jnp.float32).at[0, :hidden_size].set(
        raw["b_hh"].astype(jnp.float32))
    b_ho = jnp.zeros((1, Op), jnp.float32).at[0, :output_size].set(
        raw["b_ho"].astype(jnp.float32))

    return {
        "w_ih_x": w_ih_x, "w_ih_h": w_ih_h, "w_hh": w_hh,
        "b_hh": b_hh, "w_ho": w_ho, "b_ho": b_ho,
        "meta": {"input_size": input_size, "hidden_size": hidden_size,
                 "output_size": output_size,
                 "i_pad": Ip, "h_pad": Hp, "o_pad": Op},
    }


# ----------------------------------------------------------------------------
# Pure-JAX reference of the PyTorch forward pass
# ----------------------------------------------------------------------------
def _reference_step(x, h, raw):
    combined = jnp.concatenate([x, h], axis=1)
    h1 = jnp.tanh(combined @ raw["w_ih"])
    new_h = h1 @ raw["w_hh"] + raw["b_hh"]
    out = new_h @ raw["w_ho"] + raw["b_ho"]
    return out, new_h


def _reference_sequence(x_seq, h0, raw):
    def body(h, x):
        out, h = _reference_step(x, h, raw)
        return h, out
    h_final, outs = jax.lax.scan(body, h0, x_seq)
    return outs, h_final


if __name__ == "__main__":
    input_size, hidden_size, output_size = 16, 32, 8
    batch, seq_len = 2, 8

    key = jax.random.PRNGKey(0)
    kx, kp = jax.random.split(key, 2)

    x_seq = jax.random.normal(kx, (seq_len, batch, input_size), jnp.float32)
    h0 = jnp.zeros((batch, hidden_size), jnp.float32)       # init_hidden(batch)
    raw = init_params(kp, input_size, hidden_size, output_size)

    ref_out1, ref_h1 = _reference_step(x_seq[0], h0, raw)
    ref_out_seq, ref_h = _reference_sequence(x_seq, h0, raw)

    # --- f32 path: matches the PyTorch/JAX reference tightly. ---------------
    p32 = prepare_params(raw, input_size, hidden_size, output_size, jnp.float32)

    out1, h1 = custom_rnn_step(x_seq[0], h0, p32)            # single forward()
    out_seq, h_fin = custom_rnn_sequence(x_seq, h0, p32)     # fused T-step path
    jax.block_until_ready((out1, h1, out_seq, h_fin))

    assert out1.shape == (batch, output_size)
    assert h1.shape == (batch, hidden_size)
    assert out_seq.shape == (seq_len, batch, output_size)
    assert h_fin.shape == (batch, hidden_size)
    assert jnp.allclose(out1, ref_out1, atol=1e-5, rtol=1e-5)
    assert jnp.allclose(h1, ref_h1, atol=1e-5, rtol=1e-5)
    assert jnp.allclose(out_seq, ref_out_seq, atol=1e-5, rtol=1e-5)
    assert jnp.allclose(h_fin, ref_h, atol=1e-5, rtol=1e-5)

    # --- bf16 weight path (v6e/v7x MXU fast path): f32 accumulation. --------
    pbf = prepare_params(raw, input_size, hidden_size, output_size, jnp.bfloat16)
    out_seq_bf, h_fin_bf = custom_rnn_sequence(x_seq, h0, pbf)
    jax.block_until_ready((out_seq_bf, h_fin_bf))
    assert jnp.allclose(out_seq_bf, ref_out_seq, atol=3e-2, rtol=3e-2)
    assert jnp.allclose(h_fin_bf, ref_h, atol=3e-2, rtol=3e-2)

    print("KERNEL_OK")
</pallas_src>

<mosaic_0001>
module attributes {stable_mosaic.version = 11 : i64} {
  func.func @_gemm_bias_kernel(%arg0: i32, %arg1: i32, %arg2: i32, %arg3: memref<128x128xf32, #tpu.memory_space<vmem>>, %arg4: memref<128x128xf32, #tpu.memory_space<vmem>>, %arg5: memref<1x128xf32, #tpu.memory_space<vmem>>, %arg6: memref<128x128xf32, #tpu.memory_space<vmem>>, %arg7: memref<128x128xf32, #tpu.memory_space<vmem>>) attributes {dimension_semantics = [#tpu.dimension_semantics<parallel>, #tpu.dimension_semantics<parallel>, #tpu.dimension_semantics<arbitrary>], iteration_bounds = array<i64: 1, 1, 1>, scalar_prefetch = 0 : i64, scratch_operands = 1 : i64, tpu.core_type = #tpu.core_type<tc>, window_params = [{transform_indices = @transform_0, window_bounds = array<i64: 128, 128>}, {transform_indices = @transform_1, window_bounds = array<i64: 128, 128>}, {transform_indices = @transform_2, window_bounds = array<i64: 1, 128>}, {transform_indices = @transform_3, window_bounds = array<i64: 128, 128>}]} {
    %c0_i32 = arith.constant 0 : i32
    %0 = arith.cmpi eq, %arg2, %c0_i32 : i32
    %1 = arith.extui %0 : i1 to i32
    %c0_i32_0 = arith.constant 0 : i32
    %2 = arith.cmpi ne, %1, %c0_i32_0 : i32
    scf.if %2 {
      %cst_10 = arith.constant 0.000000e+00 : f32
      %12 = vector.broadcast %cst_10 : f32 to vector<128x128xf32>
      %c0_11 = arith.constant 0 : index
      %c0_12 = arith.constant 0 : index
      %13 = vector.load %arg7[%c0_11, %c0_12] : memref<128x128xf32, #tpu.memory_space<vmem>>, vector<128x128xf32>
      tpu.vector_store %arg7[%c0_11, %c0_12], %12 {strides = array<i32>} : memref<128x128xf32, #tpu.memory_space<vmem>>, vector<128x128xf32>,
    } else {
    }
    %c0 = arith.constant 0 : index
    %c0_1 = arith.constant 0 : index
    %3 = vector.load %arg7[%c0, %c0_1] : memref<128x128xf32, #tpu.memory_space<vmem>>, vector<128x128xf32>
    %c0_2 = arith.constant 0 : index
    %c0_3 = arith.constant 0 : index
    %4 = vector.load %arg3[%c0_2, %c0_3] : memref<128x128xf32, #tpu.memory_space<vmem>>, vector<128x128xf32>
    %c0_4 = arith.constant 0 : index
    %c0_5 = arith.constant 0 : index
    %5 = vector.load %arg4[%c0_4, %c0_5] : memref<128x128xf32, #tpu.memory_space<vmem>>, vector<128x128xf32>
    %cst = arith.constant dense<0.000000e+00> : vector<128x128xf32>
    %6 = tpu.matmul %4, %5, %cst {dimension_numbers = #tpu.dot_dimension_numbers<[1], [0], [0], [1], [0, 0, 1, 1], [], []>} : vector<128x128xf32>, vector<128x128xf32>, vector<128x128xf32> -> vector<128x128xf32>
    %7 = arith.addf %3, %6 : vector<128x128xf32>
    %c0_6 = arith.constant 0 : index
    %c0_7 = arith.constant 0 : index
    %8 = vector.load %arg7[%c0_6, %c0_7] : memref<128x128xf32, #tpu.memory_space<vmem>>, vector<128x128xf32>
    tpu.vector_store %arg7[%c0_6, %c0_7], %7 {strides = array<i32>} : memref<128x128xf32, #tpu.memory_space<vmem>>, vector<128x128xf32>,
    %c0_i32_8 = arith.constant 0 : i32
    %9 = arith.cmpi eq, %arg2, %c0_i32_8 : i32
    %10 = arith.extui %9 : i1 to i32
    %c0_i32_9 = arith.constant 0 : i32
    %11 = arith.cmpi ne, %10, %c0_i32_9 : i32
    scf.if %11 {
      %c0_10 = arith.constant 0 : index
      %c0_11 = arith.constant 0 : index
      %12 = vector.load %arg7[%c0_10, %c0_11] : memref<128x128xf32, #tpu.memory_space<vmem>>, vector<128x128xf32>
      %c0_12 = arith.constant 0 : index
      %c0_13 = arith.constant 0 : index
      %13 = vector.load %arg5[%c0_12, %c0_13] : memref<1x128xf32, #tpu.memory_space<vmem>>, vector<1x128xf32>
      %14 = vector.broadcast %13 : vector<1x128xf32> to vector<128x128xf32>
      %15 = arith.addf %12, %14 : vector<128x128xf32>
      %c0_14 = arith.constant 0 : index
      %c0_15 = arith.constant 0 : index
      %16 = vector.load %arg6[%c0_14, %c0_15] : memref<128x128xf32, #tpu.memory_space<vmem>>, vector<128x128xf32>
      tpu.vector_store %arg6[%c0_14, %c0_15], %15 {strides = array<i32>} : memref<128x128xf32, #tpu.memory_space<vmem>>, vector<128x128xf32>,
    } else {
    }
    return
  }
  func.func @transform_0(%arg0: i32, %arg1: i32, %arg2: i32) -> (i32, i32) {
    %c0_i32 = arith.constant 0 : i32
    return %arg0, %arg2 : i32, i32
  }
  func.func @transform_1(%arg0: i32, %arg1: i32, %arg2: i32) -> (i32, i32) {
    %c0_i32 = arith.constant 0 : i32
    return %arg2, %arg1 : i32, i32
  }
  func.func @transform_2(%arg0: i32, %arg1: i32, %arg2: i32) -> (i32, i32) {
    %c0_i32 = arith.constant 0 : i32
    %c0_i32_0 = arith.constant 0 : i32
    return %c0_i32, %arg1 : i32, i32
  }
  func.func @transform_3(%arg0: i32, %arg1: i32, %arg2: i32) -> (i32, i32) {
    %c0_i32 = arith.constant 0 : i32
    return %arg0, %arg1 : i32, i32
  }
}

</mosaic_0001>

<bundles_post_ra>
// kernel: tpu_custom_call.1
= control target key start
LH: loop header
LB: loop body
LE: loop exit
PB: predicated region body
PF: predicated region fallthrough
CT: control target
= control target key end

     0   :  { %8 = vsyncpa [#allocation4], 0  ;;  %s651_s0 = inlined_call_operand.hbm [shape: f32[128,128], index: 0, kind: input, shape index: {}]   ;;  %s652_s1 = inlined_call_operand.hbm [shape: f32[128,128], index: 1, kind: input, shape index: {}]   ;;  %s653_s2 = inlined_call_operand.vmem [shape: f32[1,128], index: 2, kind: input, shape index: {}]   ;;  %s654_s3 = inlined_call_operand.hbm [shape: f32[128,128], index: 3, kind: output, shape index: {}]  }
   0x1   :  { %9 = vsyncpa [#allocation7], 0 }
   0x2   :  { %10 = vsyncpa [#allocation5], 0  ;;  %s578_s12 = smov [#allocation3]   ;;  %s506_s16 = scalar_lea.hbm %s651_s0, 2048 }
   0x3   :  { %s16_s13 = sshll.u32 %s578_s12, 4  ;;  %p507_p0 = scmp.ne.s32.totalorder %s651_s0, %s506_s16  ;;  %s17_s13 = int_to_ptr.vmem [resolvable:$true] %s16_s13 }
   0x4   :  { %p510_p1 = scmp.lt.u32.totalorder %s506_s16, %s651_s0 }
   0x6   :  { %p512_p2 = pnand %p510_p1, %p507_p0 }
   0x8   :  { %515 = shalt.err (!%p512_p2)
}
   0x9   :  { %s516_s21 = scalar_lea.vmem %s17_s13, 2048  ;;  %p521_p4 = scmp.lt.s32.totalorder %s17_s13, %s17_s13 }
   0xa   :  { %p517_p3 = scmp.ne.s32.totalorder %s17_s13, %s516_s21  ;;  %p522_p5 = scmp.lt.s32.totalorder %s516_s21, %s516_s21 }
   0xc   :  { %p523_p6 = por %p522_p5, %p521_p4 }
   0xe   :  { %p524_p7 = pnand %p523_p6, %p517_p3 }
  0x10   :  { %527 = shalt.err (!%p524_p7)
}
  0x11   :  { %s579_s22 = smov 128   ;;  %s580_s23 = smov 8  }
  0x12   :  { %22 = dma.hbm_to_vmem [thread:$0]  %s651_s0, 2048, %s17_s13, [#allocation4], %s579_s22, %s579_s22, %s580_s23  }
  0x13   :  { %s581_s26 = smov [#allocation6]   ;;  %s528_s30 = scalar_lea.hbm %s652_s1, 2048 }
  0x14   :  { %s28_s27 = sshll.u32 %s581_s26, 4  ;;  %p529_p8 = scmp.ne.s32.totalorder %s652_s1, %s528_s30  ;;  %s29_s27 = int_to_ptr.vmem [resolvable:$true] %s28_s27 }
  0x15   :  { %p532_p9 = scmp.lt.u32.totalorder %s528_s30, %s652_s1 }
  0x17   :  { %p534_p10 = pnand %p532_p9, %p529_p8 }
  0x19   :  { %537 = shalt.err (!%p534_p10)
}
  0x1a   :  { %s538_s8 = scalar_lea.vmem %s29_s27, 2048  ;;  %p543_p12 = scmp.lt.s32.totalorder %s29_s27, %s29_s27 }
  0x1b   :  { %p539_p11 = scmp.ne.s32.totalorder %s29_s27, %s538_s8  ;;  %p544_p13 = scmp.lt.s32.totalorder %s538_s8, %s538_s8 }
  0x1d   :  { %p545_p0 = por %p544_p13, %p543_p12 }
  0x1f   :  { %p546_p1 = pnand %p545_p0, %p539_p11 }
  0x21   :  { %549 = shalt.err (!%p546_p1)
}
  0x22   :  { %34 = dma.hbm_to_vmem [thread:$0]  %s652_s1, 2048, %s29_s27, [#allocation7], %s579_s22, %s579_s22, %s580_s23  }
  0x23   :  { %572 = dma.done.wait [#allocation4], 2048  }
  0x24   :  { %573 = vsyncadd [#allocation4], 4294965248 }
  0x25   :  { %574 = dma.done.wait [#allocation7], 2048  }
  0x26   :  { %575 = vsyncadd [#allocation7], 4294965248  ;;  %v95_v0 = vld [vmem:[#allocation6] sm:$0xff]  ;;  %v96_v1 = vld [vmem:[#allocation6 + $0x8] sm:$0xff] }
  0x27   :  { %v97_v2 = vld [vmem:[#allocation6 + $0x10] sm:$0xff]  ;;  %v453_v3 = vpack.c.bf16 %v96_v1, %v95_v0  ;;  %v98_v4 = vld [vmem:[#allocation6 + $0x18] sm:$0xff]  ;;  %v99_v6 = vld [vmem:[#allocation6 + $0x20] sm:$0xff] }
  0x28   :  { %v457_v5 = vpack.c.bf16 %v98_v4, %v97_v2  ;;  %v100_v7 = vld [vmem:[#allocation6 + $0x28] sm:$0xff]  ;;  %v79_v9 = vld [vmem:[#allocation3] sm:$0xff]  ;;  %v101_v11 = vld [vmem:[#allocation6 + $0x30] sm:$0xff] }
  0x29   :  { %454 = vmatprep.subr.bf16.mxu0 %v453_v3  ;;  %485 = vmatprep.subr.bf16.mxu1 %v453_v3  ;;  %v461_v8 = vpack.c.bf16 %v100_v7, %v99_v6  ;;  %v87_v10 = vld [vmem:[#allocation3 + $0x40] sm:$0xff]  ;;  %v102_v12 = vld [vmem:[#allocation6 + $0x38] sm:$0xff]  ;;  %v104_v15 = vld [vmem:[#allocation6 + $0x48] sm:$0xff] }
  0x2a   :  { %456 = vmatpush3.bf16.msra.mxu0 %v453_v3  ;;  %493 = vmatpush3.bf16.msra.mxu1 %v453_v3  ;;  %v465_v13 = vpack.c.bf16 %v102_v12, %v101_v11  ;;  %v103_v14 = vld [vmem:[#allocation6 + $0x40] sm:$0xff]  ;;  %v105_v17 = vld [vmem:[#allocation6 + $0x50] sm:$0xff]  ;;  %v106_v18 = vld [vmem:[#allocation6 + $0x58] sm:$0xff] }
  0x2b   :  { %458 = vmatprep.subr.bf16.mxu0 %v457_v5  ;;  %486 = vmatprep.subr.bf16.mxu1 %v457_v5  ;;  %v469_v16 = vpack.c.bf16 %v104_v15, %v103_v14  ;;  %v473_v19 = vpack.c.bf16 %v106_v18, %v105_v17  ;;  %v107_v20 = vld [vmem:[#allocation6 + $0x60] sm:$0xff]  ;;  %v108_v21 = vld [vmem:[#allocation6 + $0x68] sm:$0xff]  ;;  %v109_v23 = vld [vmem:[#allocation6 + $0x70] sm:$0xff] }
  0x2c   :  { %429 = vmatprep.mubr.f32.mxu0 %v79_v9  ;;  %441 = vmatprep.mubr.f32.mxu1 %v87_v10  ;;  %v477_v22 = vpack.c.bf16 %v108_v21, %v107_v20  ;;  %v110_v24 = vld [vmem:[#allocation6 + $0x78] sm:$0xff]  ;;  %v80_v26 = vld [vmem:[#allocation3 + $0x8] sm:$0xff]  ;;  %v81_v28 = vld [vmem:[#allocation3 + $0x10] sm:$0xff] }
  0x2d   :  { %v481_v25 = vpack.c.bf16 %v110_v24, %v109_v23  ;;  %v88_v27 = vld [vmem:[#allocation3 + $0x48] sm:$0xff]  ;;  %v89_v29 = vld [vmem:[#allocation3 + $0x50] sm:$0xff]  ;;  %v82_v30 = vld [vmem:[#allocation3 + $0x18] sm:$0xff] }
  0x2e   :  { %460 = vmatpush3.bf16.msra.mxu0 %v457_v5  ;;  %494 = vmatpush3.bf16.msra.mxu1 %v457_v5  ;;  %v90_v31 = vld [vmem:[#allocation3 + $0x58] sm:$0xff]  ;;  %v83_v32 = vld [vmem:[#allocation3 + $0x20] sm:$0xff]  ;;  %v84_v34 = vld [vmem:[#allocation3 + $0x28] sm:$0xff] }
  0x2f   :  { %462 = vmatprep.subr.bf16.mxu0 %v461_v8  ;;  %487 = vmatprep.subr.bf16.mxu1 %v461_v8  ;;  %v91_v33 = vld [vmem:[#allocation3 + $0x60] sm:$0xff]  ;;  %v92_v35 = vld [vmem:[#allocation3 + $0x68] sm:$0xff]  ;;  %v85_v36 = vld [vmem:[#allocation3 + $0x30] sm:$0xff] }
  0x30   :  { %v93_v37 = vld [vmem:[#allocation3 + $0x70] sm:$0xff]  ;;  %v86_v38 = vld [vmem:[#allocation3 + $0x38] sm:$0xff]  ;;  %v364_v40 = vld [vmem:[%s653_s2] ss:$0 sm:$0xff]  ;;  %s582_s2 = smov [#allocation8]  }
  0x31   :  { %v94_v39 = vld [vmem:[#allocation3 + $0x78] sm:$0xff]  ;;  %s351_s11 = sshll.u32 %s582_s2, 4  ;;  %s352_s11 = int_to_ptr.vmem [resolvable:$true] %s351_s11 }
  0x32   :  { %464 = vmatpush3.bf16.msra.mxu0 %v461_v8  ;;  %495 = vmatpush3.bf16.msra.mxu1 %v461_v8  ;;  %s550_s12 = scalar_lea.vmem %s352_s11, 2048  ;;  %p555_p3 = scmp.lt.s32.totalorder %s352_s11, %s352_s11 }
  0x33   :  { %466 = vmatprep.subr.bf16.mxu0 %v465_v13  ;;  %488 = vmatprep.subr.bf16.mxu1 %v465_v13  ;;  %p551_p2 = scmp.ne.s32.totalorder %s352_s11, %s550_s12  ;;  %p556_p4 = scmp.lt.s32.totalorder %s550_s12, %s550_s12 }
  0x35   :  { %p557_p5 = por %p556_p4, %p555_p3 }
  0x36   :  { %468 = vmatpush3.bf16.msra.mxu0 %v465_v13  ;;  %496 = vmatpush3.bf16.msra.mxu1 %v465_v13 }
  0x37   :  { %470 = vmatprep.subr.bf16.mxu0 %v469_v16  ;;  %489 = vmatprep.subr.bf16.mxu1 %v469_v16  ;;  %p558_p6 = pnand %p557_p5, %p551_p2 }
  0x3a   :  { %472 = vmatpush3.bf16.msra.mxu0 %v469_v16  ;;  %497 = vmatpush3.bf16.msra.mxu1 %v469_v16 }
  0x3b   :  { %474 = vmatprep.subr.bf16.mxu0 %v473_v19  ;;  %490 = vmatprep.subr.bf16.mxu1 %v473_v19 }
  0x3e   :  { %476 = vmatpush3.bf16.msra.mxu0 %v473_v19  ;;  %498 = vmatpush3.bf16.msra.mxu1 %v473_v19 }
  0x3f   :  { %478 = vmatprep.subr.bf16.mxu0 %v477_v22  ;;  %491 = vmatprep.subr.bf16.mxu1 %v477_v22 }
  0x42   :  { %480 = vmatpush3.bf16.msra.mxu0 %v477_v22  ;;  %499 = vmatpush3.bf16.msra.mxu1 %v477_v22 }
  0x43   :  { %482 = vmatprep.subr.bf16.mxu0 %v481_v25  ;;  %492 = vmatprep.subr.bf16.mxu1 %v481_v25 }
  0x46   :  { %484 = vmatpush3.bf16.msra.mxu0 %v481_v25  ;;  %500 = vmatpush3.bf16.msra.mxu1 %v481_v25 }
  0x49   :  { %430 = vmatmul.mubr.f32.vlgmr.msra.gmra.mrb[0].mxu0 %v80_v26  ;;  %442 = vmatmul.mubr.f32.vlgmr.msra.gmra.mrb[0].mxu1 %v88_v27 }
  0x4a   :  { %432 = vmatprep.mubr.f32.mxu0 %v81_v28  ;;  %444 = vmatprep.mubr.f32.mxu1 %v89_v29 }
  0x4d   :  { %433 = vmatmul.mubr.f32.gmra.mrb[2].mxu0 %v82_v30  ;;  %445 = vmatmul.mubr.f32.gmra.mrb[2].mxu1 %v90_v31 }
  0x4e   :  { %435 = vmatprep.mubr.f32.mxu0 %v83_v32  ;;  %447 = vmatprep.mubr.f32.mxu1 %v91_v33 }
  0x51   :  { %436 = vmatmul.mubr.f32.gmra.mrb[4].mxu0 %v84_v34  ;;  %448 = vmatmul.mubr.f32.gmra.mrb[4].mxu1 %v92_v35 }
  0x52   :  { %438 = vmatprep.mubr.f32.mxu0 %v85_v36  ;;  %450 = vmatprep.mubr.f32.mxu1 %v93_v37 }
  0x55   :  { %439 = vmatmul.mubr.f32.gmra.mrb[6].mxu0 %v86_v38  ;;  %451 = vmatmul.mubr.f32.gmra.mrb[6].mxu1 %v94_v39 }
 0x11c   :  { %v431_v41 = vpop.f32.mrb[0].mxu0  ;;  %v443_v42 = vpop.f32.mrb[0].mxu1 }
 0x11d   :  { %v315_v43 = vadd.f32 %v431_v41, %v364_v40  ;;  %v323_v44 = vadd.f32 %v443_v42, %v364_v40  ;;  %v177_v45 = vpop.f32.mrb[1].mxu0  ;;  %v217_v46 = vpop.f32.mrb[1].mxu1 }
 0x11e   :  { %v314_v47 = vadd.f32 %v364_v40, %v177_v45  ;;  %v322_v48 = vadd.f32 %v364_v40, %v217_v46 }
 0x11f   :  { %331 = vst [vmem:[#allocation8 + $0x8] sm:$0xff] %v315_v43  ;;  %339 = vst [vmem:[#allocation8 + $0x48] sm:$0xff] %v323_v44 }
 0x120   :  { %330 = vst [vmem:[#allocation8] sm:$0xff] %v314_v47  ;;  %338 = vst [vmem:[#allocation8 + $0x40] sm:$0xff] %v322_v48  ;;  %v434_v49 = vpop.f32.mrb[2].mxu0  ;;  %v446_v50 = vpop.f32.mrb[2].mxu1 }
 0x121   :  { %v317_v51 = vadd.f32 %v434_v49, %v364_v40  ;;  %v325_v52 = vadd.f32 %v446_v50, %v364_v40  ;;  %v187_v53 = vpop.f32.mrb[3].mxu0  ;;  %v227_v54 = vpop.f32.mrb[3].mxu1 }
 0x122   :  { %v316_v55 = vadd.f32 %v364_v40, %v187_v53  ;;  %v324_v56 = vadd.f32 %v364_v40, %v227_v54 }
 0x123   :  { %333 = vst [vmem:[#allocation8 + $0x18] sm:$0xff] %v317_v51  ;;  %341 = vst [vmem:[#allocation8 + $0x58] sm:$0xff] %v325_v52 }
 0x124   :  { %332 = vst [vmem:[#allocation8 + $0x10] sm:$0xff] %v316_v55  ;;  %340 = vst [vmem:[#allocation8 + $0x50] sm:$0xff] %v324_v56  ;;  %v437_v57 = vpop.f32.mrb[4].mxu0  ;;  %v449_v58 = vpop.f32.mrb[4].mxu1 }
 0x125   :  { %v319_v59 = vadd.f32 %v437_v57, %v364_v40  ;;  %v327_v60 = vadd.f32 %v449_v58, %v364_v40  ;;  %v197_v61 = vpop.f32.mrb[5].mxu0  ;;  %v237_v62 = vpop.f32.mrb[5].mxu1 }
 0x126   :  { %v318_v63 = vadd.f32 %v364_v40, %v197_v61  ;;  %v326_v0 = vadd.f32 %v364_v40, %v237_v62 }
 0x127   :  { %335 = vst [vmem:[#allocation8 + $0x28] sm:$0xff] %v319_v59  ;;  %343 = vst [vmem:[#allocation8 + $0x68] sm:$0xff] %v327_v60 }
 0x128   :  { %334 = vst [vmem:[#allocation8 + $0x20] sm:$0xff] %v318_v63  ;;  %342 = vst [vmem:[#allocation8 + $0x60] sm:$0xff] %v326_v0  ;;  %v440_v1 = vpop.f32.mrb[6].mxu0  ;;  %v452_v2 = vpop.f32.mrb[6].mxu1 }
 0x129   :  { %v321_v3 = vadd.f32 %v440_v1, %v364_v40  ;;  %v329_v4 = vadd.f32 %v452_v2, %v364_v40  ;;  %v207_v5 = vpop.f32.mrb[7].mxu0  ;;  %v247_v6 = vpop.f32.mrb[7].mxu1 }
 0x12a   :  { %v320_v7 = vadd.f32 %v364_v40, %v207_v5  ;;  %v328_v8 = vadd.f32 %v364_v40, %v247_v6 }
 0x12b   :  { %337 = vst [vmem:[#allocation8 + $0x38] sm:$0xff] %v321_v3  ;;  %345 = vst [vmem:[#allocation8 + $0x78] sm:$0xff] %v329_v4 }
 0x12c   :  { %336 = vst [vmem:[#allocation8 + $0x30] sm:$0xff] %v320_v7  ;;  %344 = vst [vmem:[#allocation8 + $0x70] sm:$0xff] %v328_v8 }
 0x12d   :  { %561 = shalt.err (!%p558_p6)
}
 0x12e   :  { %s562_s15 = scalar_lea.hbm %s654_s3, 2048 }
 0x12f   :  { %p563_p7 = scmp.ne.s32.totalorder %s654_s3, %s562_s15  ;;  %p566_p8 = scmp.lt.u32.totalorder %s562_s15, %s654_s3 }
 0x131   :  { %p568_p9 = pnand %p566_p8, %p563_p7 }
 0x133   :  { %571 = shalt.err (!%p568_p9)
}
 0x134   :  { %357 = dma.vmem_to_hbm [thread:$0]  %s352_s11, 2048, %s654_s3, [#allocation5], %s579_s22, %s579_s22, %s580_s23  }
 0x135   :  { %576 = dma.done.wait [#allocation5], 2048  }
 0x136   :  { %577 = vsyncadd [#allocation5], 4294965248 }
 0x137   :  { %361 = vsyncpa [#allocation4], 1 }
 0x138   :  { %362 = vsyncpa [#allocation7], 1 }
 0x139   :  { %363 = vsyncpa [#allocation5], 1 }

</bundles_post_ra>
